<compile_context>
chip_gen: v6e
topology: v6e:2x2x1
jax: 0.10.0
libtpu: 0.0.40
codegen_flags: <defaults>
</compile_context>

<pallas_src>
import functools

import jax
import jax.numpy as jnp
from jax.experimental import pallas as pl
from jax.experimental.pallas import tpu as pltpu


def _critic_td3_fused_kernel(
    o_ref, a_ref,
    w1o_ref, w1a_ref, b1_ref,
    w2_ref, b2_ref,
    w3_ref, b3_ref,
    q_ref,
):
    """Fused twin-Q forward: 3 chained MXU matmuls, single (B, 2) store."""
    # Layer 1 (both heads): [o|a] @ [W1|W4] + [b1|b4], ReLU.
    h = (
        jnp.dot(o_ref[...], w1o_ref[...], preferred_element_type=jnp.float32)
        + jnp.dot(a_ref[...], w1a_ref[...], preferred_element_type=jnp.float32)
        + b1_ref[...]
    )
    h = jnp.maximum(h, 0.0)

    # Layer 2 (block-diagonal: heads stay independent), ReLU.
    h = jnp.dot(h, w2_ref[...], preferred_element_type=jnp.float32) + b2_ref[...]
    h = jnp.maximum(h, 0.0)

    # Layer 3 (block-diagonal -> (B, 2) == [q1 | q2]).
    q = jnp.dot(h, w3_ref[...], preferred_element_type=jnp.float32) + b3_ref[...]
    q_ref[...] = q.astype(q_ref.dtype)


def pack_critic_td3_params(params, obs_dim):
    """One-time packing of the 12 nn.Linear tensors into 7 fused arrays.

    params: (w1, b1, w2, b2, w3, b3, w4, b4, w5, b5, w6, b6)
      with weights stored as (in_dim, out_dim) and biases as (1, out_dim),
      so y = x @ W + b matches PyTorch nn.Linear exactly.
    """
    (w1, b1, w2, b2, w3, b3, w4, b4, w5, b5, w6, b6) = params
    h1 = w1.shape[1]
    h2 = w2.shape[1]

    # Layer 1: column-concat the two heads, row-split into obs / act parts.
    w1f = jnp.concatenate([w1, w4], axis=1)          # (obs_act_dim, 2*h1)
    w1o = w1f[:obs_dim]                              # (obs_dim, 2*h1)
    w1a = w1f[obs_dim:]                              # (act_dim, 2*h1)
    b1f = jnp.concatenate([b1, b4], axis=1)          # (1, 2*h1)

    # Layer 2: exact block-diagonal so heads never mix.
    z12 = jnp.zeros((h1, h2), w2.dtype)
    w2f = jnp.block([[w2, z12], [z12, w5]])          # (2*h1, 2*h2)
    b2f = jnp.concatenate([b2, b5], axis=1)          # (1, 2*h2)

    # Layer 3: block-diagonal -> 2 outputs (q1, q2).
    z3 = jnp.zeros((h2, 1), w3.dtype)
    w3f = jnp.block([[w3, z3], [z3, w6]])            # (2*h2, 2)
    b3f = jnp.concatenate([b3, b6], axis=1)          # (1, 2)

    return (w1o, w1a, b1f, w2f, b2f, w3f, b3f)


@jax.jit
def critic_td3_forward(o, a, packed):
    """Forward pass. Returns (q1, q2) each of shape (B, 1)."""
    B = o.shape[0]
    (w1o, w1a, b1f, w2f, b2f, w3f, b3f) = packed

    q = pl.pallas_call(
        _critic_td3_fused_kernel,
        out_shape=jax.ShapeDtypeStruct((B, 2), jnp.float32),
        in_specs=[pl.BlockSpec(memory_space=pltpu.VMEM)] * 9,
        out_specs=pl.BlockSpec(memory_space=pltpu.VMEM),
    )(o, a, w1o, w1a, b1f, w2f, b2f, w3f, b3f)

    return q[:, 0:1], q[:, 1:2]


def init_critic_td3_params(key, dim_info, hidden_1=128, hidden_2=128):
    """Deterministic init matching PyTorch nn.Linear default:
    U(-1/sqrt(fan_in), 1/sqrt(fan_in)) for both weight and bias.
    Weights stored (in_dim, out_dim), biases (1, out_dim)."""
    obs_act_dim = sum(dim_info)
    layer_dims = [
        (obs_act_dim, hidden_1),  # l1
        (hidden_1, hidden_2),     # l2
        (hidden_2, 1),            # l3
        (obs_act_dim, hidden_1),  # l4
        (hidden_1, hidden_2),     # l5
        (hidden_2, 1),            # l6
    ]
    params = []
    for (fan_in, fan_out) in layer_dims:
        key, kw, kb = jax.random.split(key, 3)
        bound = 1.0 / jnp.sqrt(jnp.float32(fan_in))
        w = jax.random.uniform(kw, (fan_in, fan_out), jnp.float32, -bound, bound)
        b = jax.random.uniform(kb, (1, fan_out), jnp.float32, -bound, bound)
        params.extend([w, b])
    return tuple(params)


def _reference_forward(o, a, params):
    """Pure-JAX reference mirroring the PyTorch module exactly."""
    (w1, b1, w2, b2, w3, b3, w4, b4, w5, b5, w6, b6) = params
    oa = jnp.concatenate([o, a], axis=1)
    h = jnp.maximum(oa @ w1 + b1, 0.0)
    h = jnp.maximum(h @ w2 + b2, 0.0)
    q1 = h @ w3 + b3
    g = jnp.maximum(oa @ w4 + b4, 0.0)
    g = jnp.maximum(g @ w5 + b5, 0.0)
    q2 = g @ w6 + b6
    return q1, q2


if __name__ == "__main__":
    # Small shapes consistent with the module: obs_dim=8, act_dim=4, batch=2.
    dim_info = [8, 4]
    batch = 2
    hidden_1, hidden_2 = 128, 128

    key = jax.random.PRNGKey(0)
    key, ko, ka, kp = jax.random.split(key, 4)
    o = jax.random.normal(ko, (batch, dim_info[0]), jnp.float32)
    a = jax.random.normal(ka, (batch, dim_info[1]), jnp.float32)
    params = init_critic_td3_params(kp, dim_info, hidden_1, hidden_2)

    # One-time param packing (head fusion + bias packing).
    packed = pack_critic_td3_params(params, obs_dim=dim_info[0])
    packed = jax.tree_util.tree_map(jax.block_until_ready, packed)

    q1, q2 = critic_td3_forward(o, a, packed)
    q1 = jax.block_until_ready(q1)
    q2 = jax.block_until_ready(q2)

    q1_ref, q2_ref = _reference_forward(o, a, params)
    assert q1.shape == (batch, 1) and q2.shape == (batch, 1)
    assert jnp.allclose(q1, q1_ref, atol=1e-5, rtol=1e-5)
    assert jnp.allclose(q2, q2_ref, atol=1e-5, rtol=1e-5)

    print("KERNEL_OK")
</pallas_src>

<mosaic_0001>
module attributes {stable_mosaic.version = 11 : i64} {
  func.func @_critic_td3_fused_kernel(%arg0: memref<2x8xf32, #tpu.memory_space<vmem>>, %arg1: memref<2x4xf32, #tpu.memory_space<vmem>>, %arg2: memref<8x256xf32, #tpu.memory_space<vmem>>, %arg3: memref<4x256xf32, #tpu.memory_space<vmem>>, %arg4: memref<1x256xf32, #tpu.memory_space<vmem>>, %arg5: memref<256x256xf32, #tpu.memory_space<vmem>>, %arg6: memref<1x256xf32, #tpu.memory_space<vmem>>, %arg7: memref<256x2xf32, #tpu.memory_space<vmem>>, %arg8: memref<1x2xf32, #tpu.memory_space<vmem>>, %arg9: memref<2x2xf32, #tpu.memory_space<vmem>>) attributes {dimension_semantics = [], scalar_prefetch = 0 : i64, scratch_operands = 0 : i64, tpu.core_type = #tpu.core_type<tc>} {
    %c0 = arith.constant 0 : index
    %c0_0 = arith.constant 0 : index
    %0 = vector.load %arg0[%c0, %c0_0] : memref<2x8xf32, #tpu.memory_space<vmem>>, vector<2x8xf32>
    %c0_1 = arith.constant 0 : index
    %c0_2 = arith.constant 0 : index
    %1 = vector.load %arg2[%c0_1, %c0_2] : memref<8x256xf32, #tpu.memory_space<vmem>>, vector<8x256xf32>
    %cst = arith.constant dense<0.000000e+00> : vector<2x256xf32>
    %2 = tpu.matmul %0, %1, %cst {dimension_numbers = #tpu.dot_dimension_numbers<[1], [0], [0], [1], [0, 0, 1, 1], [], []>} : vector<2x8xf32>, vector<8x256xf32>, vector<2x256xf32> -> vector<2x256xf32>
    %c0_3 = arith.constant 0 : index
    %c0_4 = arith.constant 0 : index
    %3 = vector.load %arg1[%c0_3, %c0_4] : memref<2x4xf32, #tpu.memory_space<vmem>>, vector<2x4xf32>
    %c0_5 = arith.constant 0 : index
    %c0_6 = arith.constant 0 : index
    %4 = vector.load %arg3[%c0_5, %c0_6] : memref<4x256xf32, #tpu.memory_space<vmem>>, vector<4x256xf32>
    %cst_7 = arith.constant dense<0.000000e+00> : vector<2x256xf32>
    %5 = tpu.matmul %3, %4, %cst_7 {dimension_numbers = #tpu.dot_dimension_numbers<[1], [0], [0], [1], [0, 0, 1, 1], [], []>} : vector<2x4xf32>, vector<4x256xf32>, vector<2x256xf32> -> vector<2x256xf32>
    %6 = arith.addf %2, %5 : vector<2x256xf32>
    %c0_8 = arith.constant 0 : index
    %c0_9 = arith.constant 0 : index
    %7 = vector.load %arg4[%c0_8, %c0_9] : memref<1x256xf32, #tpu.memory_space<vmem>>, vector<1x256xf32>
    %8 = vector.broadcast %7 : vector<1x256xf32> to vector<2x256xf32>
    %9 = arith.addf %6, %8 : vector<2x256xf32>
    %cst_10 = arith.constant 0.000000e+00 : f32
    %10 = vector.broadcast %cst_10 : f32 to vector<2x256xf32>
    %11 = arith.maximumf %9, %10 : vector<2x256xf32>
    %c0_11 = arith.constant 0 : index
    %c0_12 = arith.constant 0 : index
    %12 = vector.load %arg5[%c0_11, %c0_12] : memref<256x256xf32, #tpu.memory_space<vmem>>, vector<256x256xf32>
    %cst_13 = arith.constant dense<0.000000e+00> : vector<2x256xf32>
    %13 = tpu.matmul %11, %12, %cst_13 {dimension_numbers = #tpu.dot_dimension_numbers<[1], [0], [0], [1], [0, 0, 1, 1], [], []>} : vector<2x256xf32>, vector<256x256xf32>, vector<2x256xf32> -> vector<2x256xf32>
    %c0_14 = arith.constant 0 : index
    %c0_15 = arith.constant 0 : index
    %14 = vector.load %arg6[%c0_14, %c0_15] : memref<1x256xf32, #tpu.memory_space<vmem>>, vector<1x256xf32>
    %15 = vector.broadcast %14 : vector<1x256xf32> to vector<2x256xf32>
    %16 = arith.addf %13, %15 : vector<2x256xf32>
    %cst_16 = arith.constant 0.000000e+00 : f32
    %17 = vector.broadcast %cst_16 : f32 to vector<2x256xf32>
    %18 = arith.maximumf %16, %17 : vector<2x256xf32>
    %c0_17 = arith.constant 0 : index
    %c0_18 = arith.constant 0 : index
    %19 = vector.load %arg7[%c0_17, %c0_18] : memref<256x2xf32, #tpu.memory_space<vmem>>, vector<256x2xf32>
    %cst_19 = arith.constant dense<0.000000e+00> : vector<2x2xf32>
    %20 = tpu.matmul %18, %19, %cst_19 {dimension_numbers = #tpu.dot_dimension_numbers<[1], [0], [0], [1], [0, 0, 1, 1], [], []>} : vector<2x256xf32>, vector<256x2xf32>, vector<2x2xf32> -> vector<2x2xf32>
    %c0_20 = arith.constant 0 : index
    %c0_21 = arith.constant 0 : index
    %21 = vector.load %arg8[%c0_20, %c0_21] : memref<1x2xf32, #tpu.memory_space<vmem>>, vector<1x2xf32>
    %22 = vector.broadcast %21 : vector<1x2xf32> to vector<2x2xf32>
    %23 = arith.addf %20, %22 : vector<2x2xf32>
    %c0_22 = arith.constant 0 : index
    %c0_23 = arith.constant 0 : index
    %24 = vector.load %arg9[%c0_22, %c0_23] : memref<2x2xf32, #tpu.memory_space<vmem>>, vector<2x2xf32>
    tpu.vector_store %arg9[%c0_22, %c0_23], %23 {strides = array<i32>} : memref<2x2xf32, #tpu.memory_space<vmem>>, vector<2x2xf32>,
    return
  }
}

</mosaic_0001>

<bundles_post_ra>
// kernel: critic_td3_forward.1
= control target key start
LH: loop header
LB: loop body
LE: loop exit
PB: predicated region body
PF: predicated region fallthrough
CT: control target
= control target key end

     0   :  { %14 = vsyncpa [#allocation3], 0  ;;  %s556_s30 = smov [#allocation2]   ;;  %s736_s0 = inlined_call_operand.vmem [shape: f32[2,8], index: 0, kind: input, shape index: {}]   ;;  %s737_s1 = inlined_call_operand.vmem [shape: f32[2,4], index: 1, kind: input, shape index: {}]   ;;  %s738_s2 = inlined_call_operand.vmem [shape: f32[8,256], index: 2, kind: input, shape index: {}]   ;;  %s739_s3 = inlined_call_operand.vmem [shape: f32[4,256], index: 3, kind: input, shape index: {}]   ;;  %s740_s4 = inlined_call_operand.vmem [shape: f32[1,256], index: 4, kind: input, shape index: {}]   ;;  %s741_s5 = inlined_call_operand.hbm [shape: f32[256,256], index: 5, kind: input, shape index: {}]   ;;  %s742_s6 = inlined_call_operand.vmem [shape: f32[1,256], index: 6, kind: input, shape index: {}]   ;;  %s743_s7 = inlined_call_operand.vmem [shape: f32[256,2], index: 7, kind: input, shape index: {}]   ;;  %s744_s8 = inlined_call_operand.vmem [shape: f32[1,2], index: 8, kind: input, shape index: {}]   ;;  %s745_s9 = inlined_call_operand.vmem [shape: f32[2,2], index: 9, kind: output, shape index: {}]  }
   0x1   :  { %s30_s10 = sshll.u32 %s556_s30, 4  ;;  %s31_s10 = int_to_ptr.vmem [resolvable:$true] %s30_s10 }
   0x2   :  { %s542_s11 = scalar_lea.vmem %s31_s10, 8192  ;;  %p547_p1 = scmp.lt.s32.totalorder %s31_s10, %s31_s10 }
   0x3   :  { %p543_p0 = scmp.ne.s32.totalorder %s31_s10, %s542_s11  ;;  %p548_p2 = scmp.lt.s32.totalorder %s542_s11, %s542_s11 }
   0x5   :  { %p549_p3 = por %p548_p2, %p547_p1 }
   0x7   :  { %p550_p4 = pnand %p549_p3, %p543_p0 }
   0x9   :  { %553 = shalt.err (!%p550_p4)
}
   0xa   :  { %s557_s12 = smov 256   ;;  %s558_s13 = smov 16  }
   0xb   :  { %36 = dma.hbm_to_vmem [thread:$0]  %s741_s5, 8192, %s31_s10, [#allocation3], %s557_s12, %s557_s12, %s558_s13  }
   0xc   :  { %554 = dma.done.wait [#allocation3], 8192  }
   0xd   :  { %555 = vsyncadd [#allocation3], 4294959104  ;;  %v559_v0 = vmov 0.0   ;;  %v50_v1 = vld [vmem:[%s739_s3] sm:$0xff]  ;;  %vm57_vm0 = vcmask 1043456   ;;  %v255_v4 = vld [vmem:[#allocation2 + $0xf8] sm:$0xff] }
   0xe   :  { %126 = vmatprep.mubr.f32.mxu1 %v559_v0  ;;  %v52_v2 = vcombine.high %v50_v1, %v50_v1  ;;  %v49_v3 = vld [vmem:[%s737_s1] sm:$0x3]  ;;  %vm53_vm1 = vcmask 31744   ;;  %v48_v5 = vld [vmem:[%s738_s2 + $0x8] sm:$0xff]  ;;  %300 = vmatprep.subr.mxu0 %v255_v4  ;;  %v254_v6 = vld [vmem:[#allocation2 + $0xf0] sm:$0xff]  ;;  %vm133_vm2 = vcmask 64512  }
   0xf   :  { %v253_v7 = vld [vmem:[#allocation2 + $0xe8] sm:$0xff]  ;;  %v47_v8 = vld [vmem:[%s738_s2] sm:$0xff]  ;;  %301 = vmatpush1.msra.mxu0 %v254_v6  ;;  %v251_v10 = vld [vmem:[#allocation2 + $0xd8] sm:$0xff]  ;;  %vm482_vm3 = vcmask 9216  }
  0x10   :  { %489 = vmatprep.subr.msk.mxu1 %vm57_vm0, %v52_v2  ;;  %302 = vmatprep.subr.mxu0 %v253_v7  ;;  %v252_v9 = vld [vmem:[#allocation2 + $0xe0] sm:$0xff]  ;;  %v250_v12 = vld [vmem:[#allocation2 + $0xd0] sm:$0xff]  ;;  %v249_v13 = vld [vmem:[#allocation2 + $0xc8] sm:$0xff] }
  0x11   :  { %490 = vmatpush1.msk.msra.mxu1 %vm57_vm0, %v50_v1  ;;  %v46_v11 = vld [vmem:[%s736_s0] sm:$0x3]  ;;  %303 = vmatpush1.msra.mxu0 %v252_v9  ;;  %v247_v15 = vld [vmem:[#allocation2 + $0xb8] sm:$0xff]  ;;  %v246_v16 = vld [vmem:[#allocation2 + $0xb0] sm:$0xff] }
  0x12   :  { %491 = vmatmul.mubr.msk.f32.vlgmr.msra.gmra.mxu1 %vm53_vm1, %v49_v3  ;;  %167 = vmatprep.subr.mxu1 %v48_v5  ;;  %v248_v14 = vld [vmem:[#allocation2 + $0xc0] sm:$0xff]  ;;  %v245_v17 = vld [vmem:[#allocation2 + $0xa8] sm:$0xff]  ;;  %v243_v19 = vld [vmem:[#allocation2 + $0x98] sm:$0xff] }
  0x13   :  { %168 = vmatpush1.msra.mxu1 %v47_v8  ;;  %201 = vmatprep.mubr.f32.mxu1 %v559_v0  ;;  %v244_v18 = vld [vmem:[#allocation2 + $0xa0] sm:$0xff]  ;;  %v242_v20 = vld [vmem:[#allocation2 + $0x90] sm:$0xff]  ;;  %v241_v21 = vld [vmem:[#allocation2 + $0x88] sm:$0xff] }
  0x14   :  { %304 = vmatprep.subr.mxu0 %v251_v10  ;;  %v240_v22 = vld [vmem:[#allocation2 + $0x80] sm:$0xff]  ;;  %v239_v23 = vld [vmem:[#allocation2 + $0x78] sm:$0xff]  ;;  %v238_v24 = vld [vmem:[#allocation2 + $0x70] sm:$0xff] }
  0x15   :  { %305 = vmatpush1.msra.mxu0 %v250_v12  ;;  %v237_v25 = vld [vmem:[#allocation2 + $0x68] sm:$0xff]  ;;  %v236_v26 = vld [vmem:[#allocation2 + $0x60] sm:$0xff]  ;;  %v235_v27 = vld [vmem:[#allocation2 + $0x58] sm:$0xff] }
  0x16   :  { %492 = vmatmul.mubr.msk.f32.vlgmr.msra.gmra.mxu1 %vm133_vm2, %v46_v11  ;;  %306 = vmatprep.subr.mxu0 %v249_v13  ;;  %v234_v28 = vld [vmem:[#allocation2 + $0x50] sm:$0xff]  ;;  %v233_v29 = vld [vmem:[#allocation2 + $0x48] sm:$0xff]  ;;  %v232_v30 = vld [vmem:[#allocation2 + $0x40] sm:$0xff] }
  0x17   :  { %307 = vmatpush1.msra.mxu0 %v248_v14  ;;  %v231_v31 = vld [vmem:[#allocation2 + $0x38] sm:$0xff]  ;;  %v230_v32 = vld [vmem:[#allocation2 + $0x30] sm:$0xff]  ;;  %v229_v33 = vld [vmem:[#allocation2 + $0x28] sm:$0xff] }
  0x18   :  { %308 = vmatprep.subr.mxu0 %v247_v15  ;;  %v228_v34 = vld [vmem:[#allocation2 + $0x20] sm:$0xff]  ;;  %v227_v35 = vld [vmem:[#allocation2 + $0x18] sm:$0xff]  ;;  %v226_v36 = vld [vmem:[#allocation2 + $0x10] sm:$0xff] }
  0x19   :  { %309 = vmatpush1.msra.mxu0 %v246_v16  ;;  %v225_v37 = vld [vmem:[#allocation2 + $0x8] sm:$0xff]  ;;  %v224_v38 = vld [vmem:[#allocation2] sm:$0xff]  ;;  %v287_v39 = vld [vmem:[#allocation2 + $0x1f8] sm:$0xff] }
  0x1a   :  { %310 = vmatprep.subr.mxu0 %v245_v17  ;;  %v286_v40 = vld [vmem:[#allocation2 + $0x1f0] sm:$0xff]  ;;  %v285_v41 = vld [vmem:[#allocation2 + $0x1e8] sm:$0xff]  ;;  %v284_v42 = vld [vmem:[#allocation2 + $0x1e0] sm:$0xff] }
  0x1b   :  { %311 = vmatpush1.msra.mxu0 %v244_v18  ;;  %v283_v43 = vld [vmem:[#allocation2 + $0x1d8] sm:$0xff]  ;;  %v282_v44 = vld [vmem:[#allocation2 + $0x1d0] sm:$0xff]  ;;  %v281_v45 = vld [vmem:[#allocation2 + $0x1c8] sm:$0xff] }
  0x1c   :  { %312 = vmatprep.subr.mxu0 %v243_v19  ;;  %v280_v46 = vld [vmem:[#allocation2 + $0x1c0] sm:$0xff]  ;;  %v279_v47 = vld [vmem:[#allocation2 + $0x1b8] sm:$0xff]  ;;  %v278_v48 = vld [vmem:[#allocation2 + $0x1b0] sm:$0xff] }
  0x1d   :  { %313 = vmatpush1.msra.mxu0 %v242_v20  ;;  %v277_v49 = vld [vmem:[#allocation2 + $0x1a8] sm:$0xff]  ;;  %v276_v50 = vld [vmem:[#allocation2 + $0x1a0] sm:$0xff]  ;;  %v275_v51 = vld [vmem:[#allocation2 + $0x198] sm:$0xff] }
  0x1e   :  { %314 = vmatprep.subr.mxu0 %v241_v21  ;;  %v274_v52 = vld [vmem:[#allocation2 + $0x190] sm:$0xff]  ;;  %v273_v53 = vld [vmem:[#allocation2 + $0x188] sm:$0xff]  ;;  %v272_v54 = vld [vmem:[#allocation2 + $0x180] sm:$0xff] }
  0x1f   :  { %315 = vmatpush1.msra.mxu0 %v240_v22  ;;  %v271_v55 = vld [vmem:[#allocation2 + $0x178] sm:$0xff]  ;;  %v270_v56 = vld [vmem:[#allocation2 + $0x170] sm:$0xff]  ;;  %v269_v57 = vld [vmem:[#allocation2 + $0x168] sm:$0xff] }
  0x20   :  { %316 = vmatprep.subr.mxu0 %v239_v23  ;;  %v268_v58 = vld [vmem:[#allocation2 + $0x160] sm:$0xff]  ;;  %v267_v59 = vld [vmem:[#allocation2 + $0x158] sm:$0xff]  ;;  %v266_v60 = vld [vmem:[#allocation2 + $0x150] sm:$0xff] }
  0x21   :  { %317 = vmatpush1.msra.mxu0 %v238_v24  ;;  %v265_v61 = vld [vmem:[#allocation2 + $0x148] sm:$0xff]  ;;  %v264_v62 = vld [vmem:[#allocation2 + $0x140] sm:$0xff]  ;;  %v263_v63 = vld [vmem:[#allocation2 + $0x138] sm:$0xff] }
  0x22   :  { %318 = vmatprep.subr.mxu0 %v237_v25  ;;  %v262_v0 = vld [vmem:[#allocation2 + $0x130] sm:$0xff]  ;;  %v261_v1 = vld [vmem:[#allocation2 + $0x128] sm:$0xff]  ;;  %v260_v2 = vld [vmem:[#allocation2 + $0x120] sm:$0xff] }
  0x23   :  { %319 = vmatpush1.msra.mxu0 %v236_v26  ;;  %v259_v3 = vld [vmem:[#allocation2 + $0x118] sm:$0xff]  ;;  %v258_v4 = vld [vmem:[#allocation2 + $0x110] sm:$0xff]  ;;  %v257_v5 = vld [vmem:[#allocation2 + $0x108] sm:$0xff] }
  0x24   :  { %320 = vmatprep.subr.mxu0 %v235_v27  ;;  %v256_v6 = vld [vmem:[#allocation2 + $0x100] sm:$0xff]  ;;  %v404_v7 = vld [vmem:[%s743_s7 + $0xf8] sm:$0xff]  ;;  %v403_v9 = vld [vmem:[%s743_s7 + $0xf0] sm:$0xff] }
  0x25   :  { %321 = vmatpush1.msra.mxu0 %v234_v28  ;;  %v388_v8 = vld [vmem:[%s743_s7 + $0x78] sm:$0xff]  ;;  %494 = vmatprep.subr.mxu1 %v404_v7  ;;  %v387_v10 = vld [vmem:[%s743_s7 + $0x70] sm:$0xff]  ;;  %v402_v11 = vld [vmem:[%s743_s7 + $0xe8] sm:$0xff] }
  0x26   :  { %322 = vmatprep.subr.mxu0 %v233_v29  ;;  %495 = vmatpush3.msra.mxu1 %v388_v8  ;;  %v386_v12 = vld [vmem:[%s743_s7 + $0x68] sm:$0xff]  ;;  %v401_v13 = vld [vmem:[%s743_s7 + $0xe0] sm:$0xff]  ;;  %v400_v15 = vld [vmem:[%s743_s7 + $0xd8] sm:$0xff] }
  0x27   :  { %323 = vmatpush1.msra.mxu0 %v232_v30  ;;  %496 = vmatprep.subr.mxu1 %v403_v9  ;;  %v385_v14 = vld [vmem:[%s743_s7 + $0x60] sm:$0xff]  ;;  %v384_v16 = vld [vmem:[%s743_s7 + $0x58] sm:$0xff]  ;;  %v399_v17 = vld [vmem:[%s743_s7 + $0xd0] sm:$0xff] }
  0x28   :  { %324 = vmatprep.subr.mxu0 %v231_v31  ;;  %497 = vmatpush3.msra.mxu1 %v387_v10  ;;  %v383_v18 = vld [vmem:[%s743_s7 + $0x50] sm:$0xff]  ;;  %v398_v19 = vld [vmem:[%s743_s7 + $0xc8] sm:$0xff]  ;;  %v397_v21 = vld [vmem:[%s743_s7 + $0xc0] sm:$0xff]  ;;  %v210_v31 = vlaneseq }
  0x29   :  { %325 = vmatpush1.msra.mxu0 %v230_v32  ;;  %498 = vmatprep.subr.mxu1 %v402_v11  ;;  %v382_v20 = vld [vmem:[%s743_s7 + $0x48] sm:$0xff]  ;;  %v381_v22 = vld [vmem:[%s743_s7 + $0x40] sm:$0xff]  ;;  %v396_v23 = vld [vmem:[%s743_s7 + $0xb8] sm:$0xff] }
  0x2a   :  { %326 = vmatprep.subr.mxu0 %v229_v33  ;;  %499 = vmatpush3.msra.mxu1 %v386_v12  ;;  %v380_v24 = vld [vmem:[%s743_s7 + $0x38] sm:$0xff]  ;;  %v395_v25 = vld [vmem:[%s743_s7 + $0xb0] sm:$0xff]  ;;  %v394_v27 = vld [vmem:[%s743_s7 + $0xa8] sm:$0xff]  ;;  %v211_v32 = vshrl.u32 %v210_v31, 7 }
  0x2b   :  { %327 = vmatpush1.msra.mxu0 %v228_v34  ;;  %500 = vmatprep.subr.mxu1 %v401_v13  ;;  %v379_v26 = vld [vmem:[%s743_s7 + $0x30] sm:$0xff]  ;;  %v378_v28 = vld [vmem:[%s743_s7 + $0x28] sm:$0xff]  ;;  %v393_v29 = vld [vmem:[%s743_s7 + $0xa0] sm:$0xff] }
  0x2c   :  { %328 = vmatprep.subr.mxu0 %v227_v35  ;;  %501 = vmatpush3.msra.mxu1 %v385_v14  ;;  %v377_v30 = vld [vmem:[%s743_s7 + $0x20] sm:$0xff]  ;;  %v212_v34 = vsub.s32 0, %v211_v32 }
  0x2d   :  { %329 = vmatpush1.msra.mxu0 %v226_v36  ;;  %502 = vmatprep.subr.mxu1 %v400_v15  ;;  %v208_v35 = vld [vmem:[%s740_s4] sm:$0x3]  ;;  %v216_v36 = vsub.s32 1, %v211_v32 }
  0x2e   :  { %330 = vmatprep.subr.mxu0 %v225_v37  ;;  %503 = vmatpush3.msra.mxu1 %v384_v16 }
  0x2f   :  { %331 = vmatpush1.msra.mxu0 %v224_v38  ;;  %504 = vmatprep.subr.mxu1 %v399_v17 }
  0x30   :  { %332 = vmatprep.subr.mxu0 %v287_v39  ;;  %505 = vmatpush3.msra.mxu1 %v383_v18  ;;  %v213_v39 = vrot.slane %v208_v35, %v212_v34 }
  0x31   :  { %333 = vmatpush2.msra.mxu0 %v286_v40  ;;  %506 = vmatprep.subr.mxu1 %v398_v19 }
  0x32   :  { %334 = vmatprep.subr.mxu0 %v285_v41  ;;  %507 = vmatpush3.msra.mxu1 %v382_v20  ;;  %v217_v41 = vrot.slane %v208_v35, %v216_v36 }
  0x33   :  { %335 = vmatpush2.msra.mxu0 %v284_v42  ;;  %508 = vmatprep.subr.mxu1 %v397_v21 }
  0x34   :  { %336 = vmatprep.subr.mxu0 %v283_v43  ;;  %509 = vmatpush3.msra.mxu1 %v381_v22 }
  0x35   :  { %337 = vmatpush2.msra.mxu0 %v282_v44  ;;  %510 = vmatprep.subr.mxu1 %v396_v23 }
  0x36   :  { %338 = vmatprep.subr.mxu0 %v281_v45  ;;  %511 = vmatpush3.msra.mxu1 %v380_v24 }
  0x37   :  { %339 = vmatpush2.msra.mxu0 %v280_v46  ;;  %512 = vmatprep.subr.mxu1 %v395_v25 }
  0x38   :  { %340 = vmatprep.subr.mxu0 %v279_v47  ;;  %513 = vmatpush3.msra.mxu1 %v379_v26 }
  0x39   :  { %341 = vmatpush2.msra.mxu0 %v278_v48  ;;  %514 = vmatprep.subr.mxu1 %v394_v27  ;;  %v392_v48 = vld [vmem:[%s743_s7 + $0x98] sm:$0xff] }
  0x3a   :  { %342 = vmatprep.subr.mxu0 %v277_v49  ;;  %515 = vmatpush3.msra.mxu1 %v378_v28  ;;  %v376_v49 = vld [vmem:[%s743_s7 + $0x18] sm:$0xff] }
  0x3b   :  { %343 = vmatpush2.msra.mxu0 %v276_v50  ;;  %516 = vmatprep.subr.mxu1 %v393_v29  ;;  %v391_v50 = vld [vmem:[%s743_s7 + $0x90] sm:$0xff] }
  0x3c   :  { %344 = vmatprep.subr.mxu0 %v275_v51  ;;  %517 = vmatpush3.msra.mxu1 %v377_v30  ;;  %v375_v51 = vld [vmem:[%s743_s7 + $0x10] sm:$0xff] }
  0x3d   :  { %345 = vmatpush2.msra.mxu0 %v274_v52  ;;  %518 = vmatprep.subr.mxu1 %v392_v48  ;;  %v390_v52 = vld [vmem:[%s743_s7 + $0x88] sm:$0xff] }
  0x3e   :  { %346 = vmatprep.subr.mxu0 %v273_v53  ;;  %519 = vmatpush3.msra.mxu1 %v376_v49  ;;  %v374_v53 = vld [vmem:[%s743_s7 + $0x8] sm:$0xff] }
  0x3f   :  { %347 = vmatpush2.msra.mxu0 %v272_v54  ;;  %520 = vmatprep.subr.mxu1 %v391_v50  ;;  %v389_v54 = vld [vmem:[%s743_s7 + $0x80] sm:$0xff] }
  0x40   :  { %348 = vmatprep.subr.mxu0 %v271_v55  ;;  %521 = vmatpush3.msra.mxu1 %v375_v51  ;;  %v373_v55 = vld [vmem:[%s743_s7] sm:$0xff] }
  0x41   :  { %349 = vmatpush2.msra.mxu0 %v270_v56  ;;  %522 = vmatprep.subr.mxu1 %v390_v52  ;;  %v288_v56 = vld [vmem:[%s742_s6] sm:$0x3] }
  0x42   :  { %350 = vmatprep.subr.mxu0 %v269_v57  ;;  %523 = vmatpush3.msra.mxu1 %v374_v53  ;;  %v293_v57 = vrot.slane %v288_v56, %v212_v34 }
  0x43   :  { %351 = vmatpush2.msra.mxu0 %v268_v58  ;;  %524 = vmatprep.subr.mxu1 %v389_v54  ;;  %v297_v58 = vrot.slane %v288_v56, %v216_v36 }
  0x44   :  { %352 = vmatprep.subr.mxu0 %v267_v59  ;;  %525 = vmatpush3.msra.mxu1 %v373_v55 }
  0x45   :  { %353 = vmatpush2.msra.mxu0 %v266_v60 }
  0x46   :  { %354 = vmatprep.subr.mxu0 %v265_v61 }
  0x47   :  { %355 = vmatpush2.msra.mxu0 %v264_v62 }
  0x48   :  { %356 = vmatprep.subr.mxu0 %v263_v63 }
  0x49   :  { %357 = vmatpush2.msra.mxu0 %v262_v0 }
  0x4a   :  { %358 = vmatprep.subr.mxu0 %v261_v1 }
  0x4b   :  { %359 = vmatpush2.msra.mxu0 %v260_v2  ;;  %v493_v2 = vld [vmem:[%s744_s8] ss:$0 sm:$0xff] }
  0x4c   :  { %360 = vmatprep.subr.mxu0 %v259_v3 }
  0x4d   :  { %361 = vmatpush2.msra.mxu0 %v258_v4 }
  0x4e   :  { %362 = vmatprep.subr.mxu0 %v257_v5 }
  0x4f   :  { %363 = vmatpush2.msra.mxu0 %v256_v6 }
  0xd2   :  { %v128_v33 = vpop.f32.mrf.mxu1 }
  0xd4   :  { %v130_v37 = vpop.f32.mrf.mxu1 }
  0xd6   :  { %v203_v38 = vpop.f32.mrf.mxu1 }
  0xd7   :  { %v204_v40 = vadd.f32 %v203_v38, %v128_v33 }
  0xd8   :  { %v205_v42 = vpop.f32.mrf.mxu1 }
  0xd9   :  { %v206_v43 = vadd.f32 %v205_v42, %v130_v37  ;;  %v220_v44 = vadd.f32 %v213_v39, %v204_v40 }
  0xdb   :  { %v221_v45 = vadd.f32 %v217_v41, %v206_v43  ;;  %v222_v47 = vmax.f32 %v220_v44, 0.0 }
  0xdd   :  { %v223_v46 = vmax.f32 %v221_v45, 0.0 }
  0xdf   :  { %364 = vmatprep.mubr.f32.mxu0 %v223_v46 }
  0xe0   :  { %365 = vmatmul.mubr.f32.vlgmr.msra.gmra.mxu0 %v222_v47 }
 0x1a0   :  { %v366_v59 = vpop.f32.mrf.mxu0 }
 0x1a1   :  { %v367_v60 = vadd.f32 %v366_v59, %v293_v57 }
 0x1a2   :  { %v368_v61 = vpop.f32.mrf.mxu0 }
 0x1a3   :  { %v369_v62 = vadd.f32 %v368_v61, %v297_v58  ;;  %v371_v0 = vmax.f32 %v367_v60, 0.0 }
 0x1a5   :  { %v372_v63 = vmax.f32 %v369_v62, 0.0 }
 0x1a7   :  { %476 = vmatprep.mubr.f32.mxu1 %v372_v63 }
 0x1a8   :  { %477 = vmatmul.mubr.f32.vlgmr.msra.gmra.mxu1 %v371_v0 }
 0x268   :  { %v526_v1 = vpop.f32.mrf.mxu1 }
 0x26a   :  { %v527_v3 = vpop.f32.mrf.mxu1 }
 0x26b   :  { %v528_v4 = vadd.f32 %v527_v3, %v526_v1 }
 0x26d   :  { %v479_v5 = vadd.f32 %v528_v4, %v493_v2 }
 0x26f   :  { %483 = vst.msk [vmem:[%s745_s9] sm:$0x3] %vm482_vm3, %v479_v5 }
 0x270   :  { %488 = vsyncpa [#allocation3], 1 }

</bundles_post_ra>
